<compile_context>
chip_gen: v7x
topology: tpu7x:2x2x1
jax: 0.10.0
libtpu: 0.0.40
codegen_flags: <defaults>
</compile_context>

<pallas_src>
import jax
import jax.numpy as jnp
from jax.experimental import pallas as pl
from jax.experimental.pallas import tpu as pltpu


def _round_up(x, m):
    return ((x + m - 1) // m) * m


# K-tile width for the flattened-input (embedder contraction) dimension.
_KP = 512


def caam_kernel(x_ref, we_ref, wc_ref, out_ref, acc_ref):
    """One (batch-tile, K-tile) step of: ReLU(x @ We) @ Wc.

    x_ref  : [TM, TK]        bf16  flattened input tile
    we_ref : [TK, F_pad]     bf16  embedder weight K-slab (pre-transposed, padded)
    wc_ref : [F_pad, NC_pad] bf16  averaged classifier weight (pre-transposed, padded)
    out_ref: [TM, NC_pad]    f32   y_pred tile (padded classes are zero)
    acc_ref: [TM, F_pad]     f32   VMEM accumulator for x @ We across K tiles
    """
    k = pl.program_id(1)

    @pl.when(k == 0)
    def _():
        acc_ref[...] = jnp.zeros_like(acc_ref)

    acc_ref[...] += jnp.dot(
        x_ref[...], we_ref[...], preferred_element_type=jnp.float32
    )

    @pl.when(k == pl.num_programs(1) - 1)
    def _():
        x_causal = jnp.maximum(acc_ref[...], 0.0).astype(jnp.bfloat16)
        out_ref[...] = jnp.dot(
            x_causal, wc_ref[...], preferred_element_type=jnp.float32
        ).astype(out_ref.dtype)


def prepare_weights(w_embed, linear_w, *, f_pad_to=128, nc_pad_to=128):
    """One-time host-side prep: transpose, zero-pad, cast bf16 (outside the hot path).

    w_embed : [F, D_in]  (torch.nn.Linear convention: out_features, in_features)
    linear_w: [NC, F]    (averaged fc weight)
    Returns (we_t [D_pad, F_pad] bf16, wc_t [F_pad, NC_pad] bf16).
    """
    F, d_in = w_embed.shape
    NC = linear_w.shape[0]
    F_pad = _round_up(max(F, f_pad_to), 128)
    NC_pad = _round_up(max(NC, nc_pad_to), 128)
    D_pad = _round_up(d_in, 8) if d_in <= _KP else _round_up(d_in, _KP)

    we_t = jnp.zeros((D_pad, F_pad), jnp.bfloat16)
    we_t = we_t.at[:d_in, :F].set(w_embed.T.astype(jnp.bfloat16))

    wc_t = jnp.zeros((F_pad, NC_pad), jnp.bfloat16)
    wc_t = wc_t.at[:F, :NC].set(linear_w.T.astype(jnp.bfloat16))
    return we_t, wc_t


def caam_forward(x_nchw, we_t, wc_t, num_classes, *, tm_max=128):
    """Fused embedder + mean-fc classifier. Returns [B, num_classes] f32."""
    B = x_nchw.shape[0]
    d_in = x_nchw.shape[1] * x_nchw.shape[2] * x_nchw.shape[3]
    D_pad, F_pad = we_t.shape
    NC_pad = wc_t.shape[1]

    # Batch tiling: cap at tm_max, shrink for tiny batches (sublane multiple of 8).
    tm = min(tm_max, _round_up(B, 8))
    B_pad = _round_up(B, tm)
    n_b_tiles = B_pad // tm

    # K tiling of the flattened input dimension.
    tk = D_pad if D_pad <= _KP else _KP
    n_k_tiles = D_pad // tk

    # Flatten NCHW row-major, cast bf16, zero-pad batch and K to tile multiples.
    x_flat = x_nchw.reshape(B, d_in).astype(jnp.bfloat16)
    x_pad = jnp.pad(x_flat, ((0, B_pad - B), (0, D_pad - d_in)))

    itemsize = 2  # bf16 inputs
    cost = pl.CostEstimate(
        flops=2 * B_pad * D_pad * F_pad + 2 * B_pad * F_pad * NC_pad,
        transcendentals=0,
        bytes_accessed=(B_pad * D_pad + D_pad * F_pad + F_pad * NC_pad) * itemsize
        + B_pad * NC_pad * 4,
    )

    out = pl.pallas_call(
        caam_kernel,
        out_shape=jax.ShapeDtypeStruct((B_pad, NC_pad), jnp.float32),
        grid_spec=pltpu.PrefetchScalarGridSpec(
            num_scalar_prefetch=0,
            grid=(n_b_tiles, n_k_tiles),
            in_specs=[
                pl.BlockSpec((tm, tk), lambda i, k: (i, k)),        # x tile
                pl.BlockSpec((tk, F_pad), lambda i, k: (k, 0)),     # embedder weight slab
                pl.BlockSpec((F_pad, NC_pad), lambda i, k: (0, 0)),  # classifier weight
            ],
            out_specs=pl.BlockSpec((tm, NC_pad), lambda i, k: (i, 0)),
            scratch_shapes=[pltpu.VMEM((tm, F_pad), jnp.float32)],
        ),
        compiler_params=pltpu.CompilerParams(
            dimension_semantics=("parallel", "arbitrary"),
        ),
        cost_estimate=cost,
    )(x_pad, we_t, wc_t)

    # Slice off batch / class padding.
    return out[:B, :num_classes]


if __name__ == "__main__":
    key = jax.random.PRNGKey(0)
    k_x, k_we, k_fc = jax.random.split(key, 3)

    # Small shapes consistent with the module's forward (NCHW image batch).
    B, C, H, W = 2, 4, 16, 16
    feat_dim = 32          # embedder output feature dim
    num_classes = 10       # fc.weight rows
    num_linears = 2        # len(nets) - 1

    x = jax.random.normal(k_x, (B, C, H, W), dtype=jnp.float32)

    # Deterministic synthetic embedder weight (stand-in for nets[-1]).
    w_embed = 0.02 * jax.random.normal(k_we, (feat_dim, C * H * W), dtype=jnp.float32)

    # self.linear_w = stack([net.fc.weight for net in linears], 0).mean(0)
    fc_weights = 0.1 * jax.random.normal(
        k_fc, (num_linears, num_classes, feat_dim), dtype=jnp.float32
    )
    linear_w = jnp.mean(fc_weights, axis=0)

    # One-time weight prep (outside the per-call hot path).
    we_t, wc_t = prepare_weights(w_embed, linear_w)

    y_pred = caam_forward(x, we_t, wc_t, num_classes)
    y_pred = jax.block_until_ready(y_pred)

    # Reference (same bf16-operand / f32-accumulate recipe) in plain JAX.
    x_bf = x.reshape(B, -1).astype(jnp.bfloat16)
    x_causal_ref = jnp.maximum(
        jnp.dot(x_bf, w_embed.T.astype(jnp.bfloat16),
                preferred_element_type=jnp.float32), 0.0
    )
    y_ref = jnp.dot(
        x_causal_ref.astype(jnp.bfloat16), linear_w.T.astype(jnp.bfloat16),
        preferred_element_type=jnp.float32,
    )

    assert y_pred.shape == (B, num_classes)
    assert jnp.allclose(y_pred, y_ref, atol=2e-2, rtol=2e-2), (
        jnp.max(jnp.abs(y_pred - y_ref))
    )

    print("KERNEL_OK")
</pallas_src>

<mosaic_0001>
module attributes {stable_mosaic.version = 11 : i64} {
  func.func @caam_kernel(%arg0: i32, %arg1: i32, %arg2: memref<8x512xbf16, #tpu.memory_space<vmem>>, %arg3: memref<512x128xbf16, #tpu.memory_space<vmem>>, %arg4: memref<128x128xbf16, #tpu.memory_space<vmem>>, %arg5: memref<8x128xf32, #tpu.memory_space<vmem>>, %arg6: memref<8x128xf32, #tpu.memory_space<vmem>>) attributes {dimension_semantics = [#tpu.dimension_semantics<parallel>, #tpu.dimension_semantics<arbitrary>], iteration_bounds = array<i64: 1, 2>, scalar_prefetch = 0 : i64, scratch_operands = 1 : i64, tpu.core_type = #tpu.core_type<tc>, window_params = [{transform_indices = @transform_0, window_bounds = array<i64: 8, 512>}, {transform_indices = @transform_1, window_bounds = array<i64: 512, 128>}, {pipeline_mode = #tpu.pipeline_mode<synchronous>, transform_indices = @transform_2, window_bounds = array<i64: 128, 128>}, {transform_indices = @transform_3, window_bounds = array<i64: 8, 128>}]} {
    %c0_i32 = arith.constant 0 : i32
    %0 = arith.cmpi eq, %arg1, %c0_i32 : i32
    %1 = arith.extui %0 : i1 to i32
    %c0_i32_0 = arith.constant 0 : i32
    %2 = arith.cmpi ne, %1, %c0_i32_0 : i32
    scf.if %2 {
      %cst_9 = arith.constant 0.000000e+00 : f32
      %12 = vector.broadcast %cst_9 : f32 to vector<8x128xf32>
      %c0_10 = arith.constant 0 : index
      %c0_11 = arith.constant 0 : index
      %13 = vector.load %arg6[%c0_10, %c0_11] : memref<8x128xf32, #tpu.memory_space<vmem>>, vector<8x128xf32>
      tpu.vector_store %arg6[%c0_10, %c0_11], %12 {strides = array<i32>} : memref<8x128xf32, #tpu.memory_space<vmem>>, vector<8x128xf32>,
    } else {
    }
    %c0 = arith.constant 0 : index
    %c0_1 = arith.constant 0 : index
    %3 = vector.load %arg6[%c0, %c0_1] : memref<8x128xf32, #tpu.memory_space<vmem>>, vector<8x128xf32>
    %c0_2 = arith.constant 0 : index
    %c0_3 = arith.constant 0 : index
    %4 = vector.load %arg2[%c0_2, %c0_3] : memref<8x512xbf16, #tpu.memory_space<vmem>>, vector<8x512xbf16>
    %c0_4 = arith.constant 0 : index
    %c0_5 = arith.constant 0 : index
    %5 = vector.load %arg3[%c0_4, %c0_5] : memref<512x128xbf16, #tpu.memory_space<vmem>>, vector<512x128xbf16>
    %cst = arith.constant dense<0.000000e+00> : vector<8x128xf32>
    %6 = tpu.matmul %4, %5, %cst {dimension_numbers = #tpu.dot_dimension_numbers<[1], [0], [0], [1], [0, 0, 1, 1], [], []>} : vector<8x512xbf16>, vector<512x128xbf16>, vector<8x128xf32> -> vector<8x128xf32>
    %7 = arith.addf %3, %6 : vector<8x128xf32>
    %c0_6 = arith.constant 0 : index
    %c0_7 = arith.constant 0 : index
    %8 = vector.load %arg6[%c0_6, %c0_7] : memref<8x128xf32, #tpu.memory_space<vmem>>, vector<8x128xf32>
    tpu.vector_store %arg6[%c0_6, %c0_7], %7 {strides = array<i32>} : memref<8x128xf32, #tpu.memory_space<vmem>>, vector<8x128xf32>,
    %c1_i32 = arith.constant 1 : i32
    %9 = arith.cmpi eq, %arg1, %c1_i32 : i32
    %10 = arith.extui %9 : i1 to i32
    %c0_i32_8 = arith.constant 0 : i32
    %11 = arith.cmpi ne, %10, %c0_i32_8 : i32
    scf.if %11 {
      %c0_9 = arith.constant 0 : index
      %c0_10 = arith.constant 0 : index
      %12 = vector.load %arg6[%c0_9, %c0_10] : memref<8x128xf32, #tpu.memory_space<vmem>>, vector<8x128xf32>
      %cst_11 = arith.constant 0.000000e+00 : f32
      %13 = vector.broadcast %cst_11 : f32 to vector<8x128xf32>
      %14 = arith.maximumf %12, %13 : vector<8x128xf32>
      %15 = arith.truncf %14 : vector<8x128xf32> to vector<8x128xbf16>
      %c0_12 = arith.constant 0 : index
      %c0_13 = arith.constant 0 : index
      %16 = vector.load %arg4[%c0_12, %c0_13] : memref<128x128xbf16, #tpu.memory_space<vmem>>, vector<128x128xbf16>
      %cst_14 = arith.constant dense<0.000000e+00> : vector<8x128xf32>
      %17 = tpu.matmul %15, %16, %cst_14 {dimension_numbers = #tpu.dot_dimension_numbers<[1], [0], [0], [1], [0, 0, 1, 1], [], []>} : vector<8x128xbf16>, vector<128x128xbf16>, vector<8x128xf32> -> vector<8x128xf32>
      %c0_15 = arith.constant 0 : index
      %c0_16 = arith.constant 0 : index
      %18 = vector.load %arg5[%c0_15, %c0_16] : memref<8x128xf32, #tpu.memory_space<vmem>>, vector<8x128xf32>
      tpu.vector_store %arg5[%c0_15, %c0_16], %17 {strides = array<i32>} : memref<8x128xf32, #tpu.memory_space<vmem>>, vector<8x128xf32>,
    } else {
    }
    return
  }
  func.func @transform_0(%arg0: i32, %arg1: i32) -> (i32, i32) {
    %c0_i32 = arith.constant 0 : i32
    return %arg0, %arg1 : i32, i32
  }
  func.func @transform_1(%arg0: i32, %arg1: i32) -> (i32, i32) {
    %c0_i32 = arith.constant 0 : i32
    %c0_i32_0 = arith.constant 0 : i32
    return %arg1, %c0_i32 : i32, i32
  }
  func.func @transform_2(%arg0: i32, %arg1: i32) -> (i32, i32) {
    %c0_i32 = arith.constant 0 : i32
    %c0_i32_0 = arith.constant 0 : i32
    %c0_i32_1 = arith.constant 0 : i32
    return %c0_i32, %c0_i32_0 : i32, i32
  }
  func.func @transform_3(%arg0: i32, %arg1: i32) -> (i32, i32) {
    %c0_i32 = arith.constant 0 : i32
    %c0_i32_0 = arith.constant 0 : i32
    return %arg0, %c0_i32 : i32, i32
  }
}

</mosaic_0001>

<bundles_post_ra>
// kernel: tpu_custom_call.1
= control target key start
LH: loop header
LB: loop body
LE: loop exit
PB: predicated region body
PF: predicated region fallthrough
CT: control target
= control target key end

     0   :  { %8 = vsyncpa [#allocation4], 0  ;;  %s1568_s0 = inlined_call_operand.hbm [shape: bf16[8,1024], index: 0, kind: input, shape index: {}]   ;;  %s1569_s1 = inlined_call_operand.hbm [shape: bf16[1024,128], index: 1, kind: input, shape index: {}]   ;;  %s1570_s2 = inlined_call_operand.hbm [shape: bf16[128,128], index: 2, kind: input, shape index: {}]   ;;  %s1571_s3 = inlined_call_operand.hbm [shape: f32[8,128], index: 3, kind: output, shape index: {}]  }
   0x1   :  { %10 = vsyncpa [#allocation4 + $0x1], 0 }
   0x2   :  { %11 = vsyncpa [#allocation7], 0 }
   0x3   :  { %13 = vsyncpa [#allocation7 + $0x1], 0 }
   0x4   :  { %14 = vsyncpa [#allocation5], 0  ;;  %s1303_s12 = smov 0   ;;  %s1305_s13 = smov 0  }
   0x5   :  { %s1307_s14 = smov 0   ;;  %s1309_s15 = smov 0  }
   0x6   :  { %s1311_s16 = smov 0   ;;  %s1313_s17 = smov 0  }
   0x7 LB: > { %s1332_s18 = sadd.s32 4294967295, %s1272_s17   ;;  %p54_p0 = scmp.ne.s32.totalorder %s1256_s13, %s1252_s12  ;;  %s1272_s17 = sphi %s1313_s17, %s20_s17   ;;  %s1268_s16 = sphi %s1311_s16, %s1587_s16   ;;  %s1264_s15 = sphi %s1309_s15, %s1586_s15   ;;  %s1260_s14 = sphi %s1307_s14, %s1585_s14   ;;  %s1256_s13 = sphi %s1305_s13, %s1584_s13   ;;  %s1252_s12 = sphi %s1303_s12, %s1583_s12  }
   0x8   : > { %p1572_p1 = scmp.eq.s32.totalorder %s1332_s18, 0  ;;  %p831_p2 = scmp.ge.s32.totalorder %s1272_s17, 1 }
   0x9   : > { %p138_p3 = scmp.lt.s32.totalorder %s1272_s17, 3  ;;  %s1274_s21 = smov [#allocation8]  }
   0xa   : > { %p1340_p4 = por %p1572_p1, %p54_p0  ;;  %s150_s22 = sshll.u32 %s1274_s21, 4  ;;  %s151_s22 = int_to_ptr.vmem [resolvable:$true] %s150_s22 }
   0xb   : > { %p1344_p5 = pnand %p831_p2, %p138_p3  ;;  %s29_s24 = sadd.s32 1, %s1268_s16 }
   0xc   : > { %s1575_s19 = scalar_select %p1340_p4, 1, 0 }
   0xd   : > { %s1576_s20 = scalar_select %p1344_p5, 1, 0 }
   0xe   : > { %p981_p6 = pneg %p1344_p5  ;;  %s1096_s27 = scalar_lea.hbm %s1570_s2, 1024 }
   0xf   : > { %p1097_p8 = scmp.ne.s32.totalorder %s1570_s2, %s1096_s27  ;;  %p1103_p12 = scmp.lt.u32.totalorder %s1096_s27, %s1570_s2 }
  0x10   : > { %p1352_p7 = pnand %p981_p6, %p1572_p1 }
  0x12   : > { %p1098_p9 = pneg %p1352_p7 }
  0x14   : > { %p1099_p10 = pnand %p1098_p9, %p1097_p8 }
  0x16   : > { %p1100_p11 = pneg %p1099_p10 }
  0x18   : > { %p1105_p13 = pnand %p1103_p12, %p1100_p11 }
  0x1a   : > { %1108 = shalt.err (!%p1105_p13)
}
  0x1b   : > { %s1109_s5 = scalar_lea.vmem %s151_s22, 1024  ;;  %p1117_p6 = scmp.lt.s32.totalorder %s151_s22, %s151_s22 }
  0x1c   : > { %p1110_p0 = scmp.ne.s32.totalorder %s151_s22, %s1109_s5  ;;  %p1118_p1 = scmp.lt.s32.totalorder %s1109_s5, %s1109_s5 }
  0x1e   : > { %p1112_p2 = pnand %p1110_p0, %p1098_p9  ;;  %p1119_p4 = por %p1118_p1, %p1117_p6 }
  0x20   : > { %p1113_p3 = pneg %p1112_p2 }
  0x22   : > { %p1120_p5 = pnand %p1119_p4, %p1113_p3 }
  0x24   : > { %1123 = shalt.err (!%p1120_p5)
}
  0x25   : > { %s1275_s6 = smov 64   ;;  %s1276_s7 = smov 4  }
  0x26   : > { %984 = dma.hbm_to_vmem [thread:$0]  (!%p1352_p7), %s1570_s2, 1024, %s151_s22, [#allocation7], %s1275_s6, %s1275_s6, %s1276_s7  }
  0x27   : > { %p30_p1 = scmp.ge.s32.totalorder %s29_s24, 2  ;;  %s41_s10 = sadd.s32 1, %s1260_s14 }
  0x28   : > { %p48_p4 = scmp.ne.s32.totalorder %s1260_s14, %s1256_s13  ;;  %p49_p5 = scmp.eq.s32.totalorder %s1272_s17, 0 }
  0x29   : > { %s1589_s24 = smov (%p30_p1, %s29_s24), 0  ;;  %p993_p9 = scmp.lt.s32.totalorder %s1272_s17, 2 }
  0x2a   : > { %p50_p8 = por %p49_p5, %p48_p4  ;;  %s37_s11 = ssub.s32 %s1268_s16, %s1589_s24 }
  0x2b   : > { %s1386_s12 = sand.u32 1, %s1260_s14   ;;  %p39_p10 = scmp.eq.s32.totalorder %s37_s11, 0 }
  0x2c   : > { %s834_s21 = sshll.u32 %s1386_s12, 4  ;;  %s894_s23 = sshll.u32 %s1268_s16, 8 }
  0x2d   : > { %s1391_s25 = scalar_select %p39_p10, %s1260_s14, %s41_s10  }
  0x2e   : > { %s1396_s27 = scalar_lea.hbm %s1568_s0, %s894_s23  ;;  %s168_s28 = scalar_lea.vmem [#allocation3], %s834_s21 }
  0x2f   : > { %s178_s29 = sshll.u32 %s168_s28, 4  ;;  %p1398_p7 = pnand %p993_p9, %p50_p8  ;;  %s1402_s29 = int_to_ptr.vmem [resolvable:$true] %s178_s29 }
  0x30   : > { %s837_s4 = sshll.u32 %s1386_s12, 8  ;;  %s165_s5 = scalar_lea.sflag [#allocation4], %s1386_s12 }
  0x31   : > { %s1124_s8 = scalar_lea.hbm %s1396_s27, 256  ;;  %p1126_p12 = pneg %p1398_p7 }
  0x32   : > { %p1125_p11 = scmp.ne.s32.totalorder %s1396_s27, %s1124_s8  ;;  %s1129_s11 = scalar_lea.hbm %s1568_s0, 512 }
  0x33   : > { %p1130_p2 = scmp.lt.u32.totalorder %s1396_s27, %s1568_s0  ;;  %p1131_p3 = scmp.lt.u32.totalorder %s1129_s11, %s1124_s8 }
  0x34   : > { %p1127_p13 = pnand %p1126_p12, %p1125_p11  ;;  %p1133_p1 = scmp.lt.u32.totalorder %s1124_s8, %s1396_s27 }
  0x35   : > { %p1132_p6 = por %p1131_p3, %p1130_p2 }
  0x36   : > { %p1128_p0 = pneg %p1127_p13 }
  0x37   : > { %p1134_p4 = por %p1133_p1, %p1132_p6 }
  0x39   : > { %p1135_p5 = pnand %p1134_p4, %p1128_p0 }
  0x3b   : > { %1138 = shalt.err (!%p1135_p5)
}
  0x3c   : > { %s1139_s22 = scalar_lea.vmem %s1402_s29, 256  ;;  %s1277_s26 = smov [#allocation3]  }
  0x3d   : > { %p1140_p8 = scmp.ne.s32.totalorder %s1402_s29, %s1139_s22  ;;  %s1144_s28 = sshll.u32 %s1277_s26, 4  ;;  %s1145_s28 = int_to_ptr.vmem [resolvable:$false] %s1144_s28 }
  0x3e   : > { %s1146_s9 = scalar_lea.vmem %s1145_s28, 512  ;;  %p1147_p11 = scmp.lt.s32.totalorder %s1402_s29, %s1145_s28 }
  0x3f   : > { %p1142_p9 = pnand %p1140_p8, %p1126_p12  ;;  %p1148_p13 = scmp.lt.s32.totalorder %s1146_s9, %s1139_s22 }
  0x41   : > { %p1143_p10 = pneg %p1142_p9  ;;  %p1149_p2 = por %p1148_p13, %p1147_p11 }
  0x43   : > { %p1150_p3 = pnand %p1149_p2, %p1143_p10 }
  0x45   : > { %1153 = shalt.err (!%p1150_p3)
}
  0x46   : > { %988 = dma.hbm_to_vmem [thread:$0]  (!%p1398_p7), %s1396_s27, 256, %s1402_s29, %s165_s5  }
  0x47   : > { %s895_s8 = sshll.u32 %s1268_s16, 12  ;;  %s189_s10 = scalar_lea.vmem [#allocation6], %s837_s4 }
  0x48   : > { %s196_s11 = sshll.u32 %s189_s10, 4  ;;  %s185_s21 = sand.u32 1, %s1272_s17   ;;  %s1434_s11 = int_to_ptr.vmem [resolvable:$true] %s196_s11 }
  0x49   : > { %s1440_s26 = scalar_lea.hbm %s1569_s1, %s895_s8  ;;  %s1442_s28 = scalar_lea.sflag [#allocation7], %s185_s21 }
  0x4a   : > { %s1154_s9 = scalar_lea.hbm %s1440_s26, 4096  ;;  %s1159_s29 = scalar_lea.hbm %s1569_s1, 8192 }
  0x4b   : > { %p1155_p0 = scmp.ne.s32.totalorder %s1440_s26, %s1154_s9  ;;  %p1160_p4 = scmp.lt.u32.totalorder %s1440_s26, %s1569_s1 }
  0x4c   : > { %p1161_p5 = scmp.lt.u32.totalorder %s1159_s29, %s1154_s9  ;;  %p1163_p9 = scmp.lt.u32.totalorder %s1154_s9, %s1440_s26 }
  0x4d   : > { %p1157_p6 = pnand %p1155_p0, %p1126_p12 }
  0x4e   : > { %p1162_p8 = por %p1161_p5, %p1160_p4 }
  0x4f   : > { %p1158_p1 = pneg %p1157_p6 }
  0x50   : > { %p1164_p10 = por %p1163_p9, %p1162_p8 }
  0x52   : > { %p1165_p11 = pnand %p1164_p10, %p1158_p1 }
  0x54   : > { %1168 = shalt.err (!%p1165_p11)
}
  0x55   : > { %s1169_s8 = scalar_lea.vmem %s1434_s11, 4096  ;;  %s1278_s10 = smov [#allocation6]  }
  0x56   : > { %p1170_p13 = scmp.ne.s32.totalorder %s1434_s11, %s1169_s8  ;;  %s1174_s21 = sshll.u32 %s1278_s10, 4  ;;  %s1175_s21 = int_to_ptr.vmem [resolvable:$false] %s1174_s21 }
  0x57   : > { %s1176_s23 = scalar_lea.vmem %s1175_s21, 8192  ;;  %p1177_p0 = scmp.lt.s32.totalorder %s1434_s11, %s1175_s21 }
  0x58   : > { %p1172_p2 = pnand %p1170_p13, %p1126_p12  ;;  %p1178_p6 = scmp.lt.s32.totalorder %s1176_s23, %s1169_s8 }
  0x5a   : > { %p1173_p3 = pneg %p1172_p2  ;;  %p1179_p4 = por %p1178_p6, %p1177_p0 }
  0x5c   : > { %p1180_p5 = pnand %p1179_p4, %p1173_p3 }
  0x5e   : > { %1183 = shalt.err (!%p1180_p5)
}
  0x5f   : > { %991 = dma.hbm_to_vmem [thread:$0]  (!%p1398_p7), %s1440_s26, 4096, %s1434_s11, %s1442_s28, %s1275_s6, %s1275_s6, %s1276_s7  }
  0x60   : > { %p1579_p12 = scmp.ne.s32.totalorder %s1576_s20, 0 }
  0x61   : > { %s210_s22 = sand.u32 (!%p1579_p12), 1, %s1256_s13   ;;  %p1580_p1 = scmp.ne.s32.totalorder (!%p1579_p12), %s1575_s19, 0 }
  0x62   : > { %208 = sbr.rel (%p1579_p12) target bundleno = 627 (0x273), region = 32  ;;  %s841_s9 = sshll.u32 (!%p1579_p12), %s210_s22, 4 }
  0x63   : > { %s211_s12 = scalar_lea.sflag (!%p1579_p12), [#allocation4], %s210_s22  ;;  %s1474_s27 = scalar_lea.vmem (!%p1579_p12), [#allocation3], %s841_s9 }
  0x69   : > { %1235 = dma.done.wait (%p1580_p1), %s211_s12, 256  }
  0x6a   : > { %1237 = vsyncadd (%p1580_p1), %s211_s12, 4294967040  ;;  %s219_s30 = sand.u32 1, %s1332_s18   ;;  %s842_s29 = sshll.u32 %s210_s22, 8 }
  0x6b   : > { %s220_s6 = scalar_lea.sflag [#allocation7], %s219_s30  ;;  %s1481_s7 = scalar_lea.vmem [#allocation6], %s842_s29 }
  0x6c   : > { %1239 = dma.done.wait (%p1580_p1), %s220_s6, 4096  }
  0x6d   : > { %1241 = vsyncadd (%p1580_p1), %s220_s6, 4294963200  ;;  %p1581_p7 = scmp.eq.s32.totalorder %s1332_s18, 0 }
  0x6f   : > { %1243 = dma.done.wait (%p1581_p7), [#allocation7], 1024   ;;  %p1582_p8 = pmov %p1581_p7 }
  0x70   : > { %p844_p9 = scmp.ne.s32.totalorder %s1264_s15, 0 }
  0x71   : > { %1245 = vsyncadd (%p1582_p8), [#allocation7], 4294966272  ;;  %v1279_v0 = vmov (!%p844_p9), 0.0  }
  0x72   : > { %256 = sbr.rel (%p844_p9) target bundleno = 121 (0x79), region = 48  ;;  %257 = vst [vmem:[#allocation2] sm:$0xff] (!%p844_p9), %v1279_v0 }
  0x79 PF: > { %v1052_v1 = vld [vmem:[%s1481_s7 + $0x40] sm:$0xff]   ;;  %v1056_v5 = vld [vmem:[%s1481_s7 + $0x48] sm:$0xff]   ;;  %v1060_v9 = vld [vmem:[%s1481_s7 + $0x50] sm:$0xff]   ;;  %p881_p10 = scmp.ne.s32.totalorder %s1264_s15, 1 }
  0x7a   : > { %v1053_v2 = vld [vmem:[%s1481_s7 + $0xc0] sm:$0xff]   ;;  %896 = vmatprep.subr.bf16.mxu0 %v1052_v1  ;;  %v1057_v6 = vld [vmem:[%s1481_s7 + $0xc8] sm:$0xff]   ;;  %v1061_v10 = vld [vmem:[%s1481_s7 + $0xd0] sm:$0xff]   ;;  %v1280_v53 = vmov (!%p881_p10), 0.0   ;;  %vm1281_vm0 = vmmov (!%p881_p10), 0  }
  0x7b   : > { %v1054_v3 = vld [vmem:[%s1481_s7] sm:$0xff]   ;;  %918 = vmatprep.subr.bf16.mxu1 %v1053_v2  ;;  %v1058_v7 = vld [vmem:[%s1481_s7 + $0x8] sm:$0xff]   ;;  %v1062_v11 = vld [vmem:[%s1481_s7 + $0x10] sm:$0xff]  }
  0x7c   : > { %v1055_v4 = vld [vmem:[%s1481_s7 + $0x80] sm:$0xff]   ;;  %897 = vmatpush3.bf16.msra.mxu0 %v1054_v3  ;;  %v1059_v8 = vld [vmem:[%s1481_s7 + $0x88] sm:$0xff]   ;;  %v1063_v12 = vld [vmem:[%s1481_s7 + $0x90] sm:$0xff]  }
  0x7d   : > { %919 = vmatpush3.bf16.msra.mxu1 %v1055_v4  ;;  %898 = vmatprep.subr.bf16.mxu0 %v1056_v5  ;;  %v1064_v13 = vld [vmem:[%s1481_s7 + $0x58] sm:$0xff]   ;;  %v1068_v17 = vld [vmem:[%s1481_s7 + $0x60] sm:$0xff]   ;;  %v1072_v21 = vld [vmem:[%s1481_s7 + $0x68] sm:$0xff]  }
  0x7e   : > { %920 = vmatprep.subr.bf16.mxu1 %v1057_v6  ;;  %v1065_v14 = vld [vmem:[%s1481_s7 + $0xd8] sm:$0xff]   ;;  %v1069_v18 = vld [vmem:[%s1481_s7 + $0xe0] sm:$0xff]   ;;  %v1073_v22 = vld [vmem:[%s1481_s7 + $0xe8] sm:$0xff]  }
  0x7f   : > { %v1066_v15 = vld [vmem:[%s1481_s7 + $0x18] sm:$0xff]   ;;  %v1070_v19 = vld [vmem:[%s1481_s7 + $0x20] sm:$0xff]   ;;  %v1074_v23 = vld [vmem:[%s1481_s7 + $0x28] sm:$0xff]  }
  0x80   : > { %899 = vmatpush3.bf16.msra.mxu0 %v1058_v7  ;;  %v1067_v16 = vld [vmem:[%s1481_s7 + $0x98] sm:$0xff]   ;;  %v1071_v20 = vld [vmem:[%s1481_s7 + $0xa0] sm:$0xff]   ;;  %v1075_v24 = vld [vmem:[%s1481_s7 + $0xa8] sm:$0xff]  }
  0x81   : > { %921 = vmatpush3.bf16.msra.mxu1 %v1059_v8  ;;  %900 = vmatprep.subr.bf16.mxu0 %v1060_v9  ;;  %v1076_v25 = vld [vmem:[%s1481_s7 + $0x70] sm:$0xff]   ;;  %v1080_v29 = vld [vmem:[%s1481_s7 + $0x78] sm:$0xff]   ;;  %v1088_v52 = vld [vmem:[#allocation8] sm:$0xff] (!%p881_p10)  }
  0x82   : > { %922 = vmatprep.subr.bf16.mxu1 %v1061_v10  ;;  %v1077_v26 = vld [vmem:[%s1481_s7 + $0xf0] sm:$0xff]   ;;  %v1081_v30 = vld [vmem:[%s1481_s7 + $0xf8] sm:$0xff]   ;;  %v1089_v54 = vld [vmem:[#allocation8 + $0x8] sm:$0xff] (!%p881_p10)  }
  0x83   : > { %v1078_v27 = vld [vmem:[%s1481_s7 + $0x30] sm:$0xff]   ;;  %v1082_v31 = vld [vmem:[%s1481_s7 + $0x38] sm:$0xff]   ;;  %v1092_v57 = vld [vmem:[#allocation8 + $0x20] sm:$0xff] (!%p881_p10)  }
  0x84   : > { %901 = vmatpush3.bf16.msra.mxu0 %v1062_v11  ;;  %v1079_v28 = vld [vmem:[%s1481_s7 + $0xb0] sm:$0xff]   ;;  %v1083_v32 = vld [vmem:[%s1481_s7 + $0xb8] sm:$0xff]   ;;  %v1093_v58 = vld [vmem:[#allocation8 + $0x28] sm:$0xff] (!%p881_p10)  }
  0x85   : > { %923 = vmatpush3.bf16.msra.mxu1 %v1063_v12  ;;  %902 = vmatprep.subr.bf16.mxu0 %v1064_v13  ;;  %v259_v33 = vld [vmem:[%s1474_s27] sm:$0xff]  ;;  %v260_v34 = vld [vmem:[%s1474_s27 + $0x8] sm:$0xff] }
  0x86   : > { %924 = vmatprep.subr.bf16.mxu1 %v1065_v14  ;;  %v845_v35 = vcombine.low %v259_v33, %v259_v33  ;;  %v846_v36 = vcombine.high %v259_v33, %v259_v33  ;;  %v847_v37 = vcombine.low %v260_v34, %v260_v34  ;;  %v848_v38 = vcombine.high %v260_v34, %v260_v34  ;;  %v258_v47 = vld [vmem:[#allocation2] sm:$0xff]  ;;  %v1090_v55 = vld [vmem:[#allocation8 + $0x10] sm:$0xff] (!%p881_p10)  }
  0x87   : > { %v1091_v56 = vld [vmem:[#allocation8 + $0x18] sm:$0xff] (!%p881_p10)   ;;  %v1094_v59 = vld [vmem:[#allocation8 + $0x30] sm:$0xff] (!%p881_p10)  }
  0x88   : > { %903 = vmatpush3.bf16.msra.mxu0 %v1066_v15  ;;  %563 = vmatprep.mubr.bf16.mxu0 %v846_v36  ;;  %v1095_v62 = vld [vmem:[#allocation8 + $0x38] sm:$0xff] (!%p881_p10)  }
  0x89   : > { %925 = vmatpush3.bf16.msra.mxu1 %v1067_v16  ;;  %904 = vmatprep.subr.bf16.mxu0 %v1068_v17 }
  0x8a   : > { %926 = vmatprep.subr.bf16.mxu1 %v1069_v18  ;;  %603 = vmatprep.mubr.bf16.mxu1 %v848_v38 }
  0x8c   : > { %905 = vmatpush3.bf16.msra.mxu0 %v1070_v19 }
  0x8d   : > { %927 = vmatpush3.bf16.msra.mxu1 %v1071_v20  ;;  %906 = vmatprep.subr.bf16.mxu0 %v1072_v21 }
  0x8e   : > { %928 = vmatprep.subr.bf16.mxu1 %v1073_v22 }
  0x90   : > { %907 = vmatpush3.bf16.msra.mxu0 %v1074_v23 }
  0x91   : > { %929 = vmatpush3.bf16.msra.mxu1 %v1075_v24  ;;  %908 = vmatprep.subr.bf16.mxu0 %v1076_v25 }
  0x92   : > { %930 = vmatprep.subr.bf16.mxu1 %v1077_v26 }
  0x94   : > { %909 = vmatpush3.bf16.msra.mxu0 %v1078_v27 }
  0x95   : > { %931 = vmatpush3.bf16.msra.mxu1 %v1079_v28  ;;  %910 = vmatprep.subr.bf16.mxu0 %v1080_v29 }
  0x96   : > { %932 = vmatprep.subr.bf16.mxu1 %v1081_v30 }
  0x98   : > { %911 = vmatpush3.bf16.msra.mxu0 %v1082_v31 }
  0x99   : > { %933 = vmatpush3.bf16.msra.mxu1 %v1083_v32  ;;  %949 = vmatprep.subr.bf16.mxu0 (!%p881_p10), %v1280_v53 }
  0x9b   : > { %564 = vmatmul.mubr.bf16.vlgmr.msra.gmra.mrb[0].mxu0 %v845_v35 }
  0x9c   : > { %604 = vmatmul.mubr.bf16.vlgmr.msra.gmra.mrb[0].mxu1 %v847_v37  ;;  %950 = vmatpush3.bf16.msra.mxu0 (!%p881_p10), %v1088_v52 }
  0x9d   : > { %965 = vmatprep.mubr.msk.bf16.mxu0 (!%p881_p10), %vm1281_vm0, %v1280_v53  ;;  %951 = vmatprep.subr.bf16.mxu0 (!%p881_p10), %v1280_v53 }
  0xa0   : > { %952 = vmatpush3.bf16.msra.mxu0 (!%p881_p10), %v1089_v54 }
  0xa1   : > { %953 = vmatprep.subr.bf16.mxu0 (!%p881_p10), %v1280_v53 }
  0xa4   : > { %954 = vmatpush3.bf16.msra.mxu0 (!%p881_p10), %v1090_v55 }
  0xa5   : > { %955 = vmatprep.subr.bf16.mxu0 (!%p881_p10), %v1280_v53 }
  0xa8   : > { %956 = vmatpush3.bf16.msra.mxu0 (!%p881_p10), %v1091_v56 }
  0xa9   : > { %957 = vmatprep.subr.bf16.mxu0 (!%p881_p10), %v1280_v53 }
  0xac   : > { %958 = vmatpush3.bf16.msra.mxu0 (!%p881_p10), %v1092_v57 }
  0xad   : > { %959 = vmatprep.subr.bf16.mxu0 (!%p881_p10), %v1280_v53 }
  0xb0   : > { %960 = vmatpush3.bf16.msra.mxu0 (!%p881_p10), %v1093_v58 }
  0xb1   : > { %961 = vmatprep.subr.bf16.mxu0 (!%p881_p10), %v1280_v53 }
  0xb4   : > { %962 = vmatpush3.bf16.msra.mxu0 (!%p881_p10), %v1094_v59 }
  0xb5   : > { %963 = vmatprep.subr.bf16.mxu0 (!%p881_p10), %v1280_v53 }
  0xb8   : > { %964 = vmatpush3.bf16.msra.mxu0 (!%p881_p10), %v1095_v62 }
 0x16e   : > { %v912_v39 = vpop.f32.mrb[0].mxu0 }
 0x16f   : > { %v934_v40 = vpop.f32.mrb[0].mxu1  ;;  %v913_v41 = vpop.f32.mrb[1].mxu0 }
 0x170   : > { %v935_v42 = vpop.f32.mrb[1].mxu1  ;;  %v914_v43 = vadd.f32 %v913_v41, %v912_v39  ;;  %v915_v45 = vpop.f32.mrb[2].mxu0 }
 0x171   : > { %v936_v44 = vadd.f32 %v935_v42, %v934_v40  ;;  %v937_v46 = vpop.f32.mrb[2].mxu1  ;;  %v916_v48 = vpop.f32.mrb[3].mxu0  ;;  %616 = sbr.rel (%p881_p10) target bundleno = 602 (0x25a), region = 52 }
 0x172   : > { %v938_v49 = vpop.f32.mrb[3].mxu1 }
 0x173   : > { %v606_v50 = vadd.f32 %v936_v44, %v914_v43 }
 0x175   : > { %v611_v51 = vadd.f32 %v606_v50, %v258_v47 }
 0x177   : > { %612 = vst [vmem:[#allocation2] sm:$0xff] %v611_v51 }
 0x17e   : > { %v617_v60 = vld [vmem:[#allocation2] sm:$0xff] }
 0x17f   : > { %v618_v61 = vmax.f32 %v617_v60, 0.0 }
 0x181   : > { %v619_v63 = vpack.c.bf16 %v618_v61, %v618_v61 }
 0x183   : > { %966 = vmatmul.mubr.bf16.vlgmr.msra.gmra.mrb[0].mxu0 %v619_v63 }
 0x256   : > { %v718_v0 = vpop.f32.mrb[0].mxu0 }
 0x257   : > { %724 = vst [vmem:[#allocation9] sm:$0xff] %v718_v0  ;;  %v967_v1 = vpop.f32.mrb[1].mxu0 }
 0x258   : > { %v721_v2 = vpop.f32.mrb[2].mxu0 }
 0x259   : > { %v968_v3 = vpop.f32.mrb[3].mxu0 }
 0x25a PF: > { %p995_p11 = scmp.eq.s32.totalorder %s1332_s18, 1  ;;  %s1282_s15 = smov [#allocation9]  }
 0x25b   : > { %s734_s19 = sshll.u32 %s1282_s15, 4  ;;  %s735_s19 = int_to_ptr.vmem [resolvable:$true] %s734_s19 }
 0x25c   : > { %s1184_s20 = scalar_lea.vmem %s735_s19, 128  ;;  %p1191_p0 = scmp.lt.s32.totalorder %s735_s19, %s735_s19 }
 0x25d   : > { %p1185_p13 = scmp.ne.s32.totalorder %s735_s19, %s1184_s20  ;;  %p1192_p6 = scmp.lt.s32.totalorder %s1184_s20, %s1184_s20 }
 0x25f   : > { %p1186_p2 = pnand %p1185_p13, %p995_p11  ;;  %p1193_p4 = por %p1192_p6, %p1191_p0 }
 0x261   : > { %p1187_p3 = pneg %p1186_p2 }
 0x263   : > { %p1194_p5 = pnand %p1193_p4, %p1187_p3 }
 0x265   : > { %1197 = shalt.err (!%p1194_p5)
}
 0x266   : > { %s1198_s28 = scalar_lea.hbm %s1571_s3, 128 }
 0x267   : > { %p1199_p12 = scmp.ne.s32.totalorder %s1571_s3, %s1198_s28  ;;  %p1204_p8 = scmp.lt.u32.totalorder %s1198_s28, %s1571_s3 }
 0x269   : > { %p1200_p1 = pnand %p1199_p12, %p995_p11 }
 0x26b   : > { %p1201_p7 = pneg %p1200_p1 }
 0x26d   : > { %p1206_p9 = pnand %p1204_p8, %p1201_p7 }
 0x26f   : > { %1209 = shalt.err (!%p1206_p9)
}
 0x270   : > { %978 = dma.vmem_to_hbm [thread:$0]  (%p995_p11), %s735_s19, 128, %s1571_s3, [#allocation5]  }
 0x271   : > { %1247 = dma.done.wait (%p995_p11), [#allocation5], 128  }
 0x272   : > { %1249 = vsyncadd (%p995_p11), [#allocation5], 4294967168 }
 0x273 PF: > { %s20_s17 = sadd.s32 1, %s1272_s17   ;;  %s1583_s12 = smov %s1256_s13 }
 0x274   : > { %p17_p10 = scmp.ge.s32.totalorder %s20_s17, 4   ;;  %s1584_s13 = smov %s1260_s14 }
 0x275   : > { %s1585_s14 = smov %s1391_s25  ;;  %s1586_s15 = smov %s1268_s16 }
 0x276   : > { %s1587_s16 = smov %s1589_s24  ;;  %19 = sbr.rel (!%p17_p10) target bundleno = 7 (0x7), region = 95 }
 0x27d   :  { %747 = vsyncpa [#allocation4], 1 }
 0x27e   :  { %749 = vsyncpa [#allocation4 + $0x1], 1 }
 0x27f   :  { %750 = vsyncpa [#allocation7], 1 }
 0x280   :  { %752 = vsyncpa [#allocation7 + $0x1], 1 }
 0x281   :  { %753 = vsyncpa [#allocation5], 1 }
 0x282   :  { %755 = vsyncpa [#allocation5 + $0x1], 1 }

</bundles_post_ra>
